<compile_context>
chip_gen: v5e
topology: v5e:2x2
jax: 0.10.0
libtpu: 0.0.40
codegen_flags: <defaults>
</compile_context>

<pallas_src>
import jax
import jax.numpy as jnp
from jax.experimental import pallas as pl
from jax.experimental.pallas import tpu as pltpu


def _cdiv(a, b):
    return -(-a // b)


def _round_up(a, m):
    return _cdiv(a, m) * m


# --------------------------------------------------------------------------
# Kernel: one row-block times a resident mixing matrix.
# --------------------------------------------------------------------------
def _row_mix_kernel(x_ref, m_ref, o_ref):
    # x_ref: (TB, Din)   input dtype
    # m_ref: (Din, Dout) compute dtype, resident (constant block index)
    # o_ref: (TB, Dout)  output dtype
    xb = x_ref[...].astype(m_ref.dtype)                     # cheap VPU cast in VMEM
    acc = jnp.dot(xb, m_ref[...], preferred_element_type=jnp.float32)
    o_ref[...] = acc.astype(o_ref.dtype)


# --------------------------------------------------------------------------
# VMEM / block-size heuristics (generation aware).
# --------------------------------------------------------------------------
def _vmem_budget():
    """Returns (vmem_limit_bytes, per-step in+out block byte target)."""
    try:
        phys = int(pltpu.get_tpu_info().vmem_capacity_bytes)
    except Exception:
        phys = 64 << 20                       # conservative (v7x-sized) default
    cap = max(16 << 20, min(int(phys * 0.75), phys - (16 << 20)))
    # ~96 MiB on v5e/v6e (128 MiB physical), ~48 MiB on v7x (64 MiB physical).
    target = (12 << 20) if phys >= (96 << 20) else (7 << 20)
    return cap, target


def _choose_rows(B, in_row_bytes, out_row_bytes, resident_bytes, temp_row_bytes,
                 vmem_cap, target_block_bytes):
    """Rows per grid step: multi-MiB blocks, multiple of 8, (roughly) even
    step count for v7x's two TensorCores, and a total VMEM footprint
    (double-buffered blocks + resident matrix + in-kernel temps) under cap."""
    row_bytes = in_row_bytes + out_row_bytes
    steps = max(1, _cdiv(B * row_bytes, target_block_bytes))
    if steps > 1:
        steps = _round_up(steps, 2)           # keep both v7x TensorCores busy
    steps = min(steps, max(1, B // 8))        # keep >= 8 rows per block
    tb = min(B, _round_up(_cdiv(B, steps), 8))

    def footprint(rows):
        return (2 * rows * (in_row_bytes + out_row_bytes)   # double-buffered blocks
                + resident_bytes                            # mixing matrix (1 buffer)
                + rows * temp_row_bytes)                    # cast copy + f32 acc

    while tb > 8 and footprint(tb) > vmem_cap:
        tb = max(8, _round_up(tb // 2, 8))
    return tb


# --------------------------------------------------------------------------
# pallas_call wrapper: out2 = x2 @ mix, rows tiled over a 1-D grid.
# --------------------------------------------------------------------------
def _row_mix(x2, mix, out_dtype, tb, vmem_limit):
    B, Din = x2.shape
    Dout = mix.shape[1]
    grid = (_cdiv(B, tb),)

    def call(resident_kwargs):
        return pl.pallas_call(
            _row_mix_kernel,
            out_shape=jax.ShapeDtypeStruct((B, Dout), out_dtype),
            grid=grid,
            in_specs=[
                pl.BlockSpec((tb, Din), lambda i: (i, 0)),
                # Constant block index -> fetched once and kept resident.
                pl.BlockSpec((Din, Dout), lambda i: (0, 0), **resident_kwargs),
            ],
            out_specs=pl.BlockSpec((tb, Dout), lambda i: (i, 0)),
            compiler_params=pltpu.CompilerParams(
                dimension_semantics=("parallel",),
                vmem_limit_bytes=int(vmem_limit),
            ),
        )(x2, mix)

    try:
        # Review item: no point double-buffering an operand that never changes.
        return call(dict(pipeline_mode=pl.Buffered(1)))
    except Exception:
        # Fallback for Pallas versions that insist on >= 2 pipeline buffers.
        return call({})


# --------------------------------------------------------------------------
# Public API
# --------------------------------------------------------------------------
def make_nconv_mixer(A, L, compute_dtype=None):
    """K = kron(A, I_L) with columns zero-padded to a multiple of 128 lanes.

    Build this once per adjacency A and pass it to nconv(..., K=K) — Graph
    WaveNet calls nconv many times with the same A, so hoisting K avoids an
    extra HBM round trip per call."""
    dtype = A.dtype if compute_dtype is None else compute_dtype
    K = jnp.kron(A.astype(dtype), jnp.eye(L, dtype=dtype))
    WL = K.shape[1]
    WLp = _round_up(WL, 128)
    if WLp != WL:
        K = jnp.pad(K, ((0, 0), (0, WLp - WL)))
    return K


def nconv(x, A, *, compute_dtype=None, out_dtype=None, rows_per_step=None,
          path=None, K=None):
    """Pallas TPU implementation of einsum('ncvl,vw->ncwl', x, A).

    x: (N, C, V, L); A: (V, W)  ->  (N, C, W, L)

    compute_dtype: dtype fed to the MXU (accumulation is always f32).
                   Defaults to x.dtype (exact semantics); pass jnp.bfloat16
                   to opt in to mixed precision.
    out_dtype:     output dtype (default: x.dtype).
    rows_per_step: override the auto-sized row block.
    path:          None (auto) | "kron" | "matmul".
    K:             optional pre-built mixer from make_nconv_mixer(A, L, ...)
                   (forces the kron path).
    """
    N, C, V, L = x.shape
    V2, W = A.shape
    assert V == V2, "A's first dim must match x's vertex dim"

    compute_dtype = jnp.dtype(x.dtype if compute_dtype is None else compute_dtype)
    out_dtype = jnp.dtype(x.dtype if out_dtype is None else out_dtype)

    x_bytes = jnp.dtype(x.dtype).itemsize
    o_bytes = out_dtype.itemsize
    k_bytes = compute_dtype.itemsize

    B = N * C
    VL, WL = V * L, W * L
    WLp = _round_up(WL, 128)

    vmem_cap, target_block = _vmem_budget()

    # ---- Path selection (review item #1): kron only while it stays HBM-bound.
    if K is not None or path == "kron":
        use_kron = True
    elif path == "matmul":
        use_kron = False
    else:
        intensity = (2.0 * VL * WL) / (VL * x_bytes + WL * o_bytes)  # flops/byte
        balance = 200.0 if k_bytes <= 2 else 100.0   # conservative across v5e/v6e/v7x
        use_kron = (intensity <= balance) and (VL * WLp * k_bytes <= (8 << 20))

    # In-kernel temporaries per row: cast copy of x, f32 accumulator, out cast.
    def temps(din, dout):
        t = dout * 4
        if compute_dtype != jnp.dtype(x.dtype):
            t += din * k_bytes
        if out_dtype != jnp.dtype(jnp.float32):
            t += dout * o_bytes
        return t

    if use_kron:
        # out2[b, w*L + l] = sum_v x2[b, v*L + l] * A[v, w],  K = kron(A, I_L).
        if K is None:
            K = make_nconv_mixer(A, L, compute_dtype)
        assert K.shape == (VL, WLp), "K must come from make_nconv_mixer(A, L, ...)"
        x2 = x.reshape(B, VL)                      # free, contiguous reshape
        tb = rows_per_step or _choose_rows(
            B, VL * x_bytes, WLp * o_bytes, VL * WLp * K.dtype.itemsize,
            temps(VL, WLp), vmem_cap, target_block)
        tb = int(min(tb, B))
        out2 = _row_mix(x2, K, out_dtype, tb, vmem_cap)
        if WLp != WL:
            out2 = out2[:, :WL]
        return out2.reshape(N, C, W, L)

    # ---- Contract-over-V path: matmul (B*L, V) @ (V, Wp), no L-fold FLOPs.
    Wp = _round_up(W, 128)
    Ap = A.astype(compute_dtype)
    if Wp != W:
        Ap = jnp.pad(Ap, ((0, 0), (0, Wp - W)))    # lane-dense output columns
    R = B * L
    # Pre/post transposes are plain XLA copies (extra HBM round trip) but far
    # cheaper than the L-fold MXU inflation of the kron path at large V*L.
    xt = jnp.transpose(x, (0, 1, 3, 2)).reshape(R, V)
    tr = rows_per_step or _choose_rows(
        R, V * x_bytes, Wp * o_bytes, V * Wp * k_bytes,
        temps(V, Wp), vmem_cap, target_block)
    tr = int(min(tr, R))
    out_t = _row_mix(xt, Ap, out_dtype, tr, vmem_cap)
    if Wp != W:
        out_t = out_t[:, :W]
    return jnp.transpose(out_t.reshape(N, C, L, W), (0, 1, 3, 2))


if __name__ == "__main__":
    # Small shapes consistent with the forward pass: x (N, C, V, L), A (V, W).
    N, C, V, L = 2, 4, 16, 16
    W = V  # adjacency-style square mixing matrix

    key = jax.random.PRNGKey(0)
    kx, ka = jax.random.split(key)
    x = jax.random.normal(kx, (N, C, V, L), dtype=jnp.float32)
    A = jax.random.normal(ka, (V, W), dtype=jnp.float32)

    ref = jnp.einsum("ncvl,vw->ncwl", x, A)

    # Default (auto) path: f32 compute; small V*L -> memory-bound kron path.
    out = jax.block_until_ready(nconv(x, A))
    assert out.shape == (N, C, W, L)
    assert out.dtype == x.dtype
    # Tolerance covers possible reduced-precision MXU passes on f32 operands.
    assert jnp.allclose(out, ref, atol=3e-2, rtol=3e-2)

    # Large-graph path (contract over V only), forced here to exercise it.
    out_mm = jax.block_until_ready(nconv(x, A, path="matmul"))
    assert out_mm.shape == (N, C, W, L)
    assert jnp.allclose(out_mm, ref, atol=3e-2, rtol=3e-2)

    print("KERNEL_OK")
</pallas_src>

<mosaic_0001>
module attributes {stable_mosaic.version = 11 : i64} {
  func.func @_row_mix_kernel(%arg0: i32, %arg1: memref<8x256xf32, #tpu.memory_space<vmem>>, %arg2: memref<256x256xf32, #tpu.memory_space<vmem>>, %arg3: memref<8x256xf32, #tpu.memory_space<vmem>>) attributes {dimension_semantics = [#tpu.dimension_semantics<parallel>], iteration_bounds = array<i64: 1>, scalar_prefetch = 0 : i64, scratch_operands = 0 : i64, tpu.core_type = #tpu.core_type<tc>, window_params = [{transform_indices = @transform_0, window_bounds = array<i64: 8, 256>}, {pipeline_mode = #tpu.pipeline_mode<synchronous>, transform_indices = @transform_1, window_bounds = array<i64: 256, 256>}, {transform_indices = @transform_2, window_bounds = array<i64: 8, 256>}]} {
    %c0 = arith.constant 0 : index
    %c0_0 = arith.constant 0 : index
    %0 = vector.load %arg1[%c0, %c0_0] : memref<8x256xf32, #tpu.memory_space<vmem>>, vector<8x256xf32>
    %c0_1 = arith.constant 0 : index
    %c0_2 = arith.constant 0 : index
    %1 = vector.load %arg2[%c0_1, %c0_2] : memref<256x256xf32, #tpu.memory_space<vmem>>, vector<256x256xf32>
    %cst = arith.constant dense<0.000000e+00> : vector<8x256xf32>
    %2 = tpu.matmul %0, %1, %cst {dimension_numbers = #tpu.dot_dimension_numbers<[1], [0], [0], [1], [0, 0, 1, 1], [], []>} : vector<8x256xf32>, vector<256x256xf32>, vector<8x256xf32> -> vector<8x256xf32>
    %c0_3 = arith.constant 0 : index
    %c0_4 = arith.constant 0 : index
    %3 = vector.load %arg3[%c0_3, %c0_4] : memref<8x256xf32, #tpu.memory_space<vmem>>, vector<8x256xf32>
    tpu.vector_store %arg3[%c0_3, %c0_4], %2 {strides = array<i32>} : memref<8x256xf32, #tpu.memory_space<vmem>>, vector<8x256xf32>,
    return
  }
  func.func @transform_0(%arg0: i32) -> (i32, i32) {
    %c0_i32 = arith.constant 0 : i32
    %c0_i32_0 = arith.constant 0 : i32
    return %arg0, %c0_i32 : i32, i32
  }
  func.func @transform_1(%arg0: i32) -> (i32, i32) {
    %c0_i32 = arith.constant 0 : i32
    %c0_i32_0 = arith.constant 0 : i32
    %c0_i32_1 = arith.constant 0 : i32
    return %c0_i32, %c0_i32_0 : i32, i32
  }
  func.func @transform_2(%arg0: i32) -> (i32, i32) {
    %c0_i32 = arith.constant 0 : i32
    %c0_i32_0 = arith.constant 0 : i32
    return %arg0, %c0_i32 : i32, i32
  }
}

module attributes {stable_mosaic.version = 11 : i64} {
  func.func @_row_mix_kernel(%arg0: i32, %arg1: memref<8x256xf32, #tpu.memory_space<vmem>>, %arg2: memref<256x256xf32, #tpu.memory_space<vmem>>, %arg3: memref<8x256xf32, #tpu.memory_space<vmem>>) attributes {dimension_semantics = [#tpu.dimension_semantics<parallel>], iteration_bounds = array<i64: 1>, scalar_prefetch = 0 : i64, scratch_operands = 0 : i64, tpu.core_type = #tpu.core_type<tc>, window_params = [{transform_indices = @transform_0, window_bounds = array<i64: 8, 256>}, {pipeline_mode = #tpu.pipeline_mode<synchronous>, transform_indices = @transform_1, window_bounds = array<i64: 256, 256>}, {transform_indices = @transform_2, window_bounds = array<i64: 8, 256>}]} {
    %c0 = arith.constant 0 : index
    %c0_0 = arith.constant 0 : index
    %0 = vector.load %arg1[%c0, %c0_0] : memref<8x256xf32, #tpu.memory_space<vmem>>, vector<8x256xf32>
    %c0_1 = arith.constant 0 : index
    %c0_2 = arith.constant 0 : index
    %1 = vector.load %arg2[%c0_1, %c0_2] : memref<256x256xf32, #tpu.memory_space<vmem>>, vector<256x256xf32>
    %cst = arith.constant dense<0.000000e+00> : vector<8x256xf32>
    %2 = tpu.matmul %0, %1, %cst {dimension_numbers = #tpu.dot_dimension_numbers<[1], [0], [0], [1], [0, 0, 1, 1], [], []>} : vector<8x256xf32>, vector<256x256xf32>, vector<8x256xf32> -> vector<8x256xf32>
    %c0_3 = arith.constant 0 : index
    %c0_4 = arith.constant 0 : index
    %3 = vector.load %arg3[%c0_3, %c0_4] : memref<8x256xf32, #tpu.memory_space<vmem>>, vector<8x256xf32>
    tpu.vector_store %arg3[%c0_3, %c0_4], %2 {strides = array<i32>} : memref<8x256xf32, #tpu.memory_space<vmem>>, vector<8x256xf32>,
    return
  }
  func.func @transform_0(%arg0: i32) -> (i32, i32) {
    %c0_i32 = arith.constant 0 : i32
    %c0_i32_0 = arith.constant 0 : i32
    return %arg0, %c0_i32 : i32, i32
  }
  func.func @transform_1(%arg0: i32) -> (i32, i32) {
    %c0_i32 = arith.constant 0 : i32
    %c0_i32_0 = arith.constant 0 : i32
    %c0_i32_1 = arith.constant 0 : i32
    return %c0_i32, %c0_i32_0 : i32, i32
  }
  func.func @transform_2(%arg0: i32) -> (i32, i32) {
    %c0_i32 = arith.constant 0 : i32
    %c0_i32_0 = arith.constant 0 : i32
    return %arg0, %c0_i32 : i32, i32
  }
}

</mosaic_0001>

<bundles_post_ra>
// kernel: tpu_custom_call.1
= control target key start
LH: loop header
LB: loop body
LE: loop exit
PB: predicated region body
PF: predicated region fallthrough
CT: control target
= control target key end

     0   :  { %7 = vsyncpa [#allocation3], 0  ;;  %s320_s0 = inlined_call_operand.hbm [shape: f32[8,256], index: 0, kind: input, shape index: {}]   ;;  %s321_s1 = inlined_call_operand.hbm [shape: f32[256,256], index: 1, kind: input, shape index: {}]   ;;  %s322_s2 = inlined_call_operand.hbm [shape: f32[8,256], index: 2, kind: output, shape index: {}]  }
   0x1   :  { %8 = vsyncpa [#allocation6], 0 }
   0x2   :  { %9 = vsyncpa [#allocation4], 0  ;;  %s15_s11 = sshll.u32 %s320_s0, 4  ;;  %s291_s12 = smov [#allocation2]   ;;  %s16_s11 = int_to_ptr.hbm [resolvable:$true] %s15_s11 }
   0x3   :  { %s17_s13 = sshll.u32 %s291_s12, 4  ;;  %s25_s16 = sshll.u32 %s321_s1, 4  ;;  %s18_s13 = int_to_ptr.vmem [resolvable:$true] %s17_s13  ;;  %s26_s16 = int_to_ptr.hbm [resolvable:$true] %s25_s16 }
   0x4   :  { %20 = dma.hbm_to_vmem [thread:$0]  %s16_s11, 256, %s18_s13, [#allocation3]  }
   0x5   :  { %s292_s17 = smov [#allocation5]   ;;  %s293_s19 = smov 256  }
   0x6   :  { %s27_s18 = sshll.u32 %s292_s17, 4  ;;  %s294_s20 = smov 16   ;;  %s28_s18 = int_to_ptr.vmem [resolvable:$true] %s27_s18 }
   0x7   :  { %33 = dma.hbm_to_vmem [thread:$0]  %s26_s16, 8192, %s28_s18, [#allocation6], %s293_s19, %s293_s19, %s294_s20  }
   0x8   :  { %285 = dma.done.wait [#allocation3], 256  }
   0x9   :  { %286 = vsyncadd [#allocation3], 4294967040 }
   0xa   :  { %287 = dma.done.wait [#allocation6], 8192  }
   0xb   :  { %288 = vsyncadd [#allocation6], 4294959104  ;;  %v75_v0 = vld [vmem:[#allocation5 + $0xf8] sm:$0xff]  ;;  %v73_v2 = vld [vmem:[#allocation5 + $0xe8] sm:$0xff]  ;;  %s295_s0 = smov [#allocation7]   ;;  %s197_s23 = sshll.u32 %s322_s2, 4  ;;  %s198_s23 = int_to_ptr.hbm [resolvable:$true] %s197_s23 }
   0xc   :  { %v107_v1 = vld [vmem:[#allocation5 + $0x1f8] sm:$0xff]  ;;  %148 = vmatpush.msra.mxu2 %v75_v0  ;;  %v105_v3 = vld [vmem:[#allocation5 + $0x1e8] sm:$0xff]  ;;  %v74_v6 = vld [vmem:[#allocation5 + $0xf0] sm:$0xff]  ;;  %s195_s1 = sshll.u32 %s295_s0, 4  ;;  %s196_s1 = int_to_ptr.vmem [resolvable:$true] %s195_s1 }
   0xd   :  { %168 = vmatpush.msra.mxu3 %v107_v1  ;;  %v71_v4 = vld [vmem:[#allocation5 + $0xd8] sm:$0xff]  ;;  %v106_v7 = vld [vmem:[#allocation5 + $0x1f0] sm:$0xff]  ;;  %v72_v8 = vld [vmem:[#allocation5 + $0xe0] sm:$0xff]  ;;  %108 = vmatpush.msra.mxu0 %v74_v6 }
   0xe   :  { %v103_v5 = vld [vmem:[#allocation5 + $0x1d8] sm:$0xff]  ;;  %149 = vmatpush.msra.mxu2 %v73_v2  ;;  %v104_v9 = vld [vmem:[#allocation5 + $0x1e0] sm:$0xff]  ;;  %128 = vmatpush.msra.mxu1 %v106_v7  ;;  %v69_v10 = vld [vmem:[#allocation5 + $0xc8] sm:$0xff] }
   0xf   :  { %169 = vmatpush.msra.mxu3 %v105_v3  ;;  %v101_v11 = vld [vmem:[#allocation5 + $0x1c8] sm:$0xff]  ;;  %v70_v12 = vld [vmem:[#allocation5 + $0xd0] sm:$0xff]  ;;  %109 = vmatpush.msra.mxu0 %v72_v8  ;;  %v67_v14 = vld [vmem:[#allocation5 + $0xb8] sm:$0xff] }
  0x10   :  { %150 = vmatpush.msra.mxu2 %v71_v4  ;;  %v102_v13 = vld [vmem:[#allocation5 + $0x1d0] sm:$0xff]  ;;  %129 = vmatpush.msra.mxu1 %v104_v9  ;;  %v99_v15 = vld [vmem:[#allocation5 + $0x1b8] sm:$0xff]  ;;  %v68_v16 = vld [vmem:[#allocation5 + $0xc0] sm:$0xff] }
  0x11   :  { %170 = vmatpush.msra.mxu3 %v103_v5  ;;  %v100_v17 = vld [vmem:[#allocation5 + $0x1c0] sm:$0xff]  ;;  %110 = vmatpush.msra.mxu0 %v70_v12  ;;  %v65_v18 = vld [vmem:[#allocation5 + $0xa8] sm:$0xff]  ;;  %v66_v20 = vld [vmem:[#allocation5 + $0xb0] sm:$0xff] }
  0x12   :  { %151 = vmatpush.msra.mxu2 %v69_v10  ;;  %130 = vmatpush.msra.mxu1 %v102_v13  ;;  %v97_v19 = vld [vmem:[#allocation5 + $0x1a8] sm:$0xff]  ;;  %v98_v21 = vld [vmem:[#allocation5 + $0x1b0] sm:$0xff]  ;;  %v63_v22 = vld [vmem:[#allocation5 + $0x98] sm:$0xff] }
  0x13   :  { %171 = vmatpush.msra.mxu3 %v101_v11  ;;  %111 = vmatpush.msra.mxu0 %v68_v16  ;;  %v95_v23 = vld [vmem:[#allocation5 + $0x198] sm:$0xff]  ;;  %v64_v24 = vld [vmem:[#allocation5 + $0xa0] sm:$0xff]  ;;  %v61_v26 = vld [vmem:[#allocation5 + $0x88] sm:$0xff] }
  0x14   :  { %152 = vmatpush.msra.mxu2 %v67_v14  ;;  %131 = vmatpush.msra.mxu1 %v100_v17  ;;  %v96_v25 = vld [vmem:[#allocation5 + $0x1a0] sm:$0xff]  ;;  %v93_v27 = vld [vmem:[#allocation5 + $0x188] sm:$0xff]  ;;  %v62_v28 = vld [vmem:[#allocation5 + $0x90] sm:$0xff] }
  0x15   :  { %172 = vmatpush.msra.mxu3 %v99_v15  ;;  %112 = vmatpush.msra.mxu0 %v66_v20  ;;  %v94_v29 = vld [vmem:[#allocation5 + $0x190] sm:$0xff]  ;;  %v59_v30 = vld [vmem:[#allocation5 + $0x78] sm:$0xff]  ;;  %v60_v32 = vld [vmem:[#allocation5 + $0x80] sm:$0xff] }
  0x16   :  { %153 = vmatpush.msra.mxu2 %v65_v18  ;;  %132 = vmatpush.msra.mxu1 %v98_v21  ;;  %v91_v31 = vld [vmem:[#allocation5 + $0x178] sm:$0xff]  ;;  %v92_v33 = vld [vmem:[#allocation5 + $0x180] sm:$0xff]  ;;  %v57_v34 = vld [vmem:[#allocation5 + $0x68] sm:$0xff] }
  0x17   :  { %173 = vmatpush.msra.mxu3 %v97_v19  ;;  %113 = vmatpush.msra.mxu0 %v64_v24  ;;  %v89_v35 = vld [vmem:[#allocation5 + $0x168] sm:$0xff]  ;;  %v58_v36 = vld [vmem:[#allocation5 + $0x70] sm:$0xff]  ;;  %v55_v38 = vld [vmem:[#allocation5 + $0x58] sm:$0xff] }
  0x18   :  { %154 = vmatpush.msra.mxu2 %v63_v22  ;;  %133 = vmatpush.msra.mxu1 %v96_v25  ;;  %v90_v37 = vld [vmem:[#allocation5 + $0x170] sm:$0xff]  ;;  %v87_v39 = vld [vmem:[#allocation5 + $0x158] sm:$0xff]  ;;  %v56_v40 = vld [vmem:[#allocation5 + $0x60] sm:$0xff] }
  0x19   :  { %174 = vmatpush.msra.mxu3 %v95_v23  ;;  %114 = vmatpush.msra.mxu0 %v62_v28  ;;  %v88_v41 = vld [vmem:[#allocation5 + $0x160] sm:$0xff]  ;;  %v53_v42 = vld [vmem:[#allocation5 + $0x48] sm:$0xff]  ;;  %v54_v44 = vld [vmem:[#allocation5 + $0x50] sm:$0xff] }
  0x1a   :  { %155 = vmatpush.msra.mxu2 %v61_v26  ;;  %134 = vmatpush.msra.mxu1 %v94_v29  ;;  %v85_v43 = vld [vmem:[#allocation5 + $0x148] sm:$0xff]  ;;  %v86_v45 = vld [vmem:[#allocation5 + $0x150] sm:$0xff]  ;;  %v51_v46 = vld [vmem:[#allocation5 + $0x38] sm:$0xff] }
  0x1b   :  { %175 = vmatpush.msra.mxu3 %v93_v27  ;;  %115 = vmatpush.msra.mxu0 %v60_v32  ;;  %v83_v47 = vld [vmem:[#allocation5 + $0x138] sm:$0xff]  ;;  %v52_v48 = vld [vmem:[#allocation5 + $0x40] sm:$0xff]  ;;  %v49_v50 = vld [vmem:[#allocation5 + $0x28] sm:$0xff] }
  0x1c   :  { %156 = vmatpush.msra.mxu2 %v59_v30  ;;  %135 = vmatpush.msra.mxu1 %v92_v33  ;;  %v84_v49 = vld [vmem:[#allocation5 + $0x140] sm:$0xff]  ;;  %v81_v51 = vld [vmem:[#allocation5 + $0x128] sm:$0xff]  ;;  %v50_v52 = vld [vmem:[#allocation5 + $0x30] sm:$0xff] }
  0x1d   :  { %176 = vmatpush.msra.mxu3 %v91_v31  ;;  %116 = vmatpush.msra.mxu0 %v58_v36  ;;  %v82_v53 = vld [vmem:[#allocation5 + $0x130] sm:$0xff]  ;;  %v47_v54 = vld [vmem:[#allocation5 + $0x18] sm:$0xff]  ;;  %v48_v56 = vld [vmem:[#allocation5 + $0x20] sm:$0xff] }
  0x1e   :  { %157 = vmatpush.msra.mxu2 %v57_v34  ;;  %136 = vmatpush.msra.mxu1 %v90_v37  ;;  %v79_v55 = vld [vmem:[#allocation5 + $0x118] sm:$0xff]  ;;  %v80_v57 = vld [vmem:[#allocation5 + $0x120] sm:$0xff]  ;;  %v45_v58 = vld [vmem:[#allocation5 + $0x8] sm:$0xff] }
  0x1f   :  { %177 = vmatpush.msra.mxu3 %v89_v35  ;;  %117 = vmatpush.msra.mxu0 %v56_v40  ;;  %v77_v59 = vld [vmem:[#allocation5 + $0x108] sm:$0xff]  ;;  %v42_v60 = vld [vmem:[#allocation2] sm:$0xff]  ;;  %v43_v61 = vld [vmem:[#allocation2 + $0x8] sm:$0xff] }
  0x20   :  { %158 = vmatpush.msra.mxu2 %v55_v38  ;;  %137 = vmatpush.msra.mxu1 %v88_v41  ;;  %v46_v62 = vld [vmem:[#allocation5 + $0x10] sm:$0xff]  ;;  %v44_v0 = vld [vmem:[#allocation5] sm:$0xff] }
  0x21   :  { %178 = vmatpush.msra.mxu3 %v87_v39  ;;  %118 = vmatpush.msra.mxu0 %v54_v44  ;;  %v78_v63 = vld [vmem:[#allocation5 + $0x110] sm:$0xff]  ;;  %v76_v1 = vld [vmem:[#allocation5 + $0x100] sm:$0xff] }
  0x22   :  { %159 = vmatpush.msra.mxu2 %v53_v42  ;;  %138 = vmatpush.msra.mxu1 %v86_v45 }
  0x23   :  { %179 = vmatpush.msra.mxu3 %v85_v43  ;;  %119 = vmatpush.msra.mxu0 %v52_v48 }
  0x24   :  { %160 = vmatpush.msra.mxu2 %v51_v46  ;;  %139 = vmatpush.msra.mxu1 %v84_v49 }
  0x25   :  { %180 = vmatpush.msra.mxu3 %v83_v47  ;;  %120 = vmatpush.msra.mxu0 %v50_v52 }
  0x26   :  { %161 = vmatpush.msra.mxu2 %v49_v50  ;;  %140 = vmatpush.msra.mxu1 %v82_v53 }
  0x27   :  { %181 = vmatpush.msra.mxu3 %v81_v51  ;;  %121 = vmatpush.msra.mxu0 %v48_v56 }
  0x28   :  { %162 = vmatpush.msra.mxu2 %v47_v54  ;;  %141 = vmatpush.msra.mxu1 %v80_v57 }
  0x29   :  { %182 = vmatpush.msra.mxu3 %v79_v55  ;;  %122 = vmatpush.msra.mxu0 %v46_v62 }
  0x2a   :  { %163 = vmatpush.msra.mxu2 %v45_v58  ;;  %142 = vmatpush.msra.mxu1 %v78_v63 }
  0x2b   :  { %183 = vmatpush.msra.mxu3 %v77_v59  ;;  %164 = vmatmul.f32.vlgmr.msra.gmra.mxu2 %v42_v60 }
  0x2c   :  { %184 = vmatmul.f32.vlgmr.msra.gmra.mxu3 %v43_v61  ;;  %123 = vmatpush.msra.mxu0 %v44_v0 }
  0x2d   :  { %143 = vmatpush.msra.mxu1 %v76_v1  ;;  %124 = vmatmul.f32.vlgmr.msra.gmra.mxu0 %v42_v60 }
  0x2e   :  { %144 = vmatmul.f32.vlgmr.msra.gmra.mxu1 %v43_v61 }
  0xaa   :  { %v125_v2 = vpop.f32.mrf.mxu0 }
  0xab   :  { %v145_v3 = vpop.f32.mrf.mxu1 }
  0xac   :  { %v146_v4 = vadd.f32 %v145_v3, %v125_v2 }
  0xae   :  { %v165_v5 = vpop.f32.mrf.mxu2  ;;  %188 = vst [vmem:[#allocation7] sm:$0xff] %v146_v4 }
  0xaf   :  { %v185_v6 = vpop.f32.mrf.mxu3 }
  0xb0   :  { %v186_v7 = vadd.f32 %v185_v6, %v165_v5 }
  0xb2   :  { %189 = vst [vmem:[#allocation7 + $0x8] sm:$0xff] %v186_v7 }
  0xb3   :  { %200 = dma.vmem_to_hbm [thread:$0]  %s196_s1, 256, %s198_s23, [#allocation4]  }
  0xb4   :  { %289 = dma.done.wait [#allocation4], 256  }
  0xb5   :  { %290 = vsyncadd [#allocation4], 4294967040 }
  0xb6   :  { %205 = vsyncpa [#allocation3], 1 }
  0xb7   :  { %206 = vsyncpa [#allocation6], 1 }
  0xb8   :  { %207 = vsyncpa [#allocation4], 1 }

// kernel: tpu_custom_call.1
= control target key start
LH: loop header
LB: loop body
LE: loop exit
PB: predicated region body
PF: predicated region fallthrough
CT: control target
= control target key end

     0   :  { %7 = vsyncpa [#allocation3], 0  ;;  %s320_s0 = inlined_call_operand.hbm [shape: f32[8,256], index: 0, kind: input, shape index: {}]   ;;  %s321_s1 = inlined_call_operand.hbm [shape: f32[256,256], index: 1, kind: input, shape index: {}]   ;;  %s322_s2 = inlined_call_operand.hbm [shape: f32[8,256], index: 2, kind: output, shape index: {}]  }
   0x1   :  { %8 = vsyncpa [#allocation6], 0 }
   0x2   :  { %9 = vsyncpa [#allocation4], 0  ;;  %s15_s11 = sshll.u32 %s320_s0, 4  ;;  %s291_s12 = smov [#allocation2]   ;;  %s16_s11 = int_to_ptr.hbm [resolvable:$true] %s15_s11 }
   0x3   :  { %s17_s13 = sshll.u32 %s291_s12, 4  ;;  %s25_s16 = sshll.u32 %s321_s1, 4  ;;  %s18_s13 = int_to_ptr.vmem [resolvable:$true] %s17_s13  ;;  %s26_s16 = int_to_ptr.hbm [resolvable:$true] %s25_s16 }
   0x4   :  { %20 = dma.hbm_to_vmem [thread:$0]  %s16_s11, 256, %s18_s13, [#allocation3]  }
   0x5   :  { %s292_s17 = smov [#allocation5]   ;;  %s293_s19 = smov 256  }
   0x6   :  { %s27_s18 = sshll.u32 %s292_s17, 4  ;;  %s294_s20 = smov 16   ;;  %s28_s18 = int_to_ptr.vmem [resolvable:$true] %s27_s18 }
   0x7   :  { %33 = dma.hbm_to_vmem [thread:$0]  %s26_s16, 8192, %s28_s18, [#allocation6], %s293_s19, %s293_s19, %s294_s20  }
   0x8   :  { %285 = dma.done.wait [#allocation3], 256  }
   0x9   :  { %286 = vsyncadd [#allocation3], 4294967040 }
   0xa   :  { %287 = dma.done.wait [#allocation6], 8192  }
   0xb   :  { %288 = vsyncadd [#allocation6], 4294959104  ;;  %v75_v0 = vld [vmem:[#allocation5 + $0xf8] sm:$0xff]  ;;  %v73_v2 = vld [vmem:[#allocation5 + $0xe8] sm:$0xff]  ;;  %s295_s0 = smov [#allocation7]   ;;  %s197_s23 = sshll.u32 %s322_s2, 4  ;;  %s198_s23 = int_to_ptr.hbm [resolvable:$true] %s197_s23 }
   0xc   :  { %v107_v1 = vld [vmem:[#allocation5 + $0x1f8] sm:$0xff]  ;;  %148 = vmatpush.msra.mxu2 %v75_v0  ;;  %v105_v3 = vld [vmem:[#allocation5 + $0x1e8] sm:$0xff]  ;;  %v74_v6 = vld [vmem:[#allocation5 + $0xf0] sm:$0xff]  ;;  %s195_s1 = sshll.u32 %s295_s0, 4  ;;  %s196_s1 = int_to_ptr.vmem [resolvable:$true] %s195_s1 }
   0xd   :  { %168 = vmatpush.msra.mxu3 %v107_v1  ;;  %v71_v4 = vld [vmem:[#allocation5 + $0xd8] sm:$0xff]  ;;  %v106_v7 = vld [vmem:[#allocation5 + $0x1f0] sm:$0xff]  ;;  %v72_v8 = vld [vmem:[#allocation5 + $0xe0] sm:$0xff]  ;;  %108 = vmatpush.msra.mxu0 %v74_v6 }
   0xe   :  { %v103_v5 = vld [vmem:[#allocation5 + $0x1d8] sm:$0xff]  ;;  %149 = vmatpush.msra.mxu2 %v73_v2  ;;  %v104_v9 = vld [vmem:[#allocation5 + $0x1e0] sm:$0xff]  ;;  %128 = vmatpush.msra.mxu1 %v106_v7  ;;  %v69_v10 = vld [vmem:[#allocation5 + $0xc8] sm:$0xff] }
   0xf   :  { %169 = vmatpush.msra.mxu3 %v105_v3  ;;  %v101_v11 = vld [vmem:[#allocation5 + $0x1c8] sm:$0xff]  ;;  %v70_v12 = vld [vmem:[#allocation5 + $0xd0] sm:$0xff]  ;;  %109 = vmatpush.msra.mxu0 %v72_v8  ;;  %v67_v14 = vld [vmem:[#allocation5 + $0xb8] sm:$0xff] }
  0x10   :  { %150 = vmatpush.msra.mxu2 %v71_v4  ;;  %v102_v13 = vld [vmem:[#allocation5 + $0x1d0] sm:$0xff]  ;;  %129 = vmatpush.msra.mxu1 %v104_v9  ;;  %v99_v15 = vld [vmem:[#allocation5 + $0x1b8] sm:$0xff]  ;;  %v68_v16 = vld [vmem:[#allocation5 + $0xc0] sm:$0xff] }
  0x11   :  { %170 = vmatpush.msra.mxu3 %v103_v5  ;;  %v100_v17 = vld [vmem:[#allocation5 + $0x1c0] sm:$0xff]  ;;  %110 = vmatpush.msra.mxu0 %v70_v12  ;;  %v65_v18 = vld [vmem:[#allocation5 + $0xa8] sm:$0xff]  ;;  %v66_v20 = vld [vmem:[#allocation5 + $0xb0] sm:$0xff] }
  0x12   :  { %151 = vmatpush.msra.mxu2 %v69_v10  ;;  %130 = vmatpush.msra.mxu1 %v102_v13  ;;  %v97_v19 = vld [vmem:[#allocation5 + $0x1a8] sm:$0xff]  ;;  %v98_v21 = vld [vmem:[#allocation5 + $0x1b0] sm:$0xff]  ;;  %v63_v22 = vld [vmem:[#allocation5 + $0x98] sm:$0xff] }
  0x13   :  { %171 = vmatpush.msra.mxu3 %v101_v11  ;;  %111 = vmatpush.msra.mxu0 %v68_v16  ;;  %v95_v23 = vld [vmem:[#allocation5 + $0x198] sm:$0xff]  ;;  %v64_v24 = vld [vmem:[#allocation5 + $0xa0] sm:$0xff]  ;;  %v61_v26 = vld [vmem:[#allocation5 + $0x88] sm:$0xff] }
  0x14   :  { %152 = vmatpush.msra.mxu2 %v67_v14  ;;  %131 = vmatpush.msra.mxu1 %v100_v17  ;;  %v96_v25 = vld [vmem:[#allocation5 + $0x1a0] sm:$0xff]  ;;  %v93_v27 = vld [vmem:[#allocation5 + $0x188] sm:$0xff]  ;;  %v62_v28 = vld [vmem:[#allocation5 + $0x90] sm:$0xff] }
  0x15   :  { %172 = vmatpush.msra.mxu3 %v99_v15  ;;  %112 = vmatpush.msra.mxu0 %v66_v20  ;;  %v94_v29 = vld [vmem:[#allocation5 + $0x190] sm:$0xff]  ;;  %v59_v30 = vld [vmem:[#allocation5 + $0x78] sm:$0xff]  ;;  %v60_v32 = vld [vmem:[#allocation5 + $0x80] sm:$0xff] }
  0x16   :  { %153 = vmatpush.msra.mxu2 %v65_v18  ;;  %132 = vmatpush.msra.mxu1 %v98_v21  ;;  %v91_v31 = vld [vmem:[#allocation5 + $0x178] sm:$0xff]  ;;  %v92_v33 = vld [vmem:[#allocation5 + $0x180] sm:$0xff]  ;;  %v57_v34 = vld [vmem:[#allocation5 + $0x68] sm:$0xff] }
  0x17   :  { %173 = vmatpush.msra.mxu3 %v97_v19  ;;  %113 = vmatpush.msra.mxu0 %v64_v24  ;;  %v89_v35 = vld [vmem:[#allocation5 + $0x168] sm:$0xff]  ;;  %v58_v36 = vld [vmem:[#allocation5 + $0x70] sm:$0xff]  ;;  %v55_v38 = vld [vmem:[#allocation5 + $0x58] sm:$0xff] }
  0x18   :  { %154 = vmatpush.msra.mxu2 %v63_v22  ;;  %133 = vmatpush.msra.mxu1 %v96_v25  ;;  %v90_v37 = vld [vmem:[#allocation5 + $0x170] sm:$0xff]  ;;  %v87_v39 = vld [vmem:[#allocation5 + $0x158] sm:$0xff]  ;;  %v56_v40 = vld [vmem:[#allocation5 + $0x60] sm:$0xff] }
  0x19   :  { %174 = vmatpush.msra.mxu3 %v95_v23  ;;  %114 = vmatpush.msra.mxu0 %v62_v28  ;;  %v88_v41 = vld [vmem:[#allocation5 + $0x160] sm:$0xff]  ;;  %v53_v42 = vld [vmem:[#allocation5 + $0x48] sm:$0xff]  ;;  %v54_v44 = vld [vmem:[#allocation5 + $0x50] sm:$0xff] }
  0x1a   :  { %155 = vmatpush.msra.mxu2 %v61_v26  ;;  %134 = vmatpush.msra.mxu1 %v94_v29  ;;  %v85_v43 = vld [vmem:[#allocation5 + $0x148] sm:$0xff]  ;;  %v86_v45 = vld [vmem:[#allocation5 + $0x150] sm:$0xff]  ;;  %v51_v46 = vld [vmem:[#allocation5 + $0x38] sm:$0xff] }
  0x1b   :  { %175 = vmatpush.msra.mxu3 %v93_v27  ;;  %115 = vmatpush.msra.mxu0 %v60_v32  ;;  %v83_v47 = vld [vmem:[#allocation5 + $0x138] sm:$0xff]  ;;  %v52_v48 = vld [vmem:[#allocation5 + $0x40] sm:$0xff]  ;;  %v49_v50 = vld [vmem:[#allocation5 + $0x28] sm:$0xff] }
  0x1c   :  { %156 = vmatpush.msra.mxu2 %v59_v30  ;;  %135 = vmatpush.msra.mxu1 %v92_v33  ;;  %v84_v49 = vld [vmem:[#allocation5 + $0x140] sm:$0xff]  ;;  %v81_v51 = vld [vmem:[#allocation5 + $0x128] sm:$0xff]  ;;  %v50_v52 = vld [vmem:[#allocation5 + $0x30] sm:$0xff] }
  0x1d   :  { %176 = vmatpush.msra.mxu3 %v91_v31  ;;  %116 = vmatpush.msra.mxu0 %v58_v36  ;;  %v82_v53 = vld [vmem:[#allocation5 + $0x130] sm:$0xff]  ;;  %v47_v54 = vld [vmem:[#allocation5 + $0x18] sm:$0xff]  ;;  %v48_v56 = vld [vmem:[#allocation5 + $0x20] sm:$0xff] }
  0x1e   :  { %157 = vmatpush.msra.mxu2 %v57_v34  ;;  %136 = vmatpush.msra.mxu1 %v90_v37  ;;  %v79_v55 = vld [vmem:[#allocation5 + $0x118] sm:$0xff]  ;;  %v80_v57 = vld [vmem:[#allocation5 + $0x120] sm:$0xff]  ;;  %v45_v58 = vld [vmem:[#allocation5 + $0x8] sm:$0xff] }
  0x1f   :  { %177 = vmatpush.msra.mxu3 %v89_v35  ;;  %117 = vmatpush.msra.mxu0 %v56_v40  ;;  %v77_v59 = vld [vmem:[#allocation5 + $0x108] sm:$0xff]  ;;  %v42_v60 = vld [vmem:[#allocation2] sm:$0xff]  ;;  %v43_v61 = vld [vmem:[#allocation2 + $0x8] sm:$0xff] }
  0x20   :  { %158 = vmatpush.msra.mxu2 %v55_v38  ;;  %137 = vmatpush.msra.mxu1 %v88_v41  ;;  %v46_v62 = vld [vmem:[#allocation5 + $0x10] sm:$0xff]  ;;  %v44_v0 = vld [vmem:[#allocation5] sm:$0xff] }
  0x21   :  { %178 = vmatpush.msra.mxu3 %v87_v39  ;;  %118 = vmatpush.msra.mxu0 %v54_v44  ;;  %v78_v63 = vld [vmem:[#allocation5 + $0x110] sm:$0xff]  ;;  %v76_v1 = vld [vmem:[#allocation5 + $0x100] sm:$0xff] }
  0x22   :  { %159 = vmatpush.msra.mxu2 %v53_v42  ;;  %138 = vmatpush.msra.mxu1 %v86_v45 }
  0x23   :  { %179 = vmatpush.msra.mxu3 %v85_v43  ;;  %119 = vmatpush.msra.mxu0 %v52_v48 }
  0x24   :  { %160 = vmatpush.msra.mxu2 %v51_v46  ;;  %139 = vmatpush.msra.mxu1 %v84_v49 }
  0x25   :  { %180 = vmatpush.msra.mxu3 %v83_v47  ;;  %120 = vmatpush.msra.mxu0 %v50_v52 }
  0x26   :  { %161 = vmatpush.msra.mxu2 %v49_v50  ;;  %140 = vmatpush.msra.mxu1 %v82_v53 }
  0x27   :  { %181 = vmatpush.msra.mxu3 %v81_v51  ;;  %121 = vmatpush.msra.mxu0 %v48_v56 }
  0x28   :  { %162 = vmatpush.msra.mxu2 %v47_v54  ;;  %141 = vmatpush.msra.mxu1 %v80_v57 }
  0x29   :  { %182 = vmatpush.msra.mxu3 %v79_v55  ;;  %122 = vmatpush.msra.mxu0 %v46_v62 }
  0x2a   :  { %163 = vmatpush.msra.mxu2 %v45_v58  ;;  %142 = vmatpush.msra.mxu1 %v78_v63 }
  0x2b   :  { %183 = vmatpush.msra.mxu3 %v77_v59  ;;  %164 = vmatmul.f32.vlgmr.msra.gmra.mxu2 %v42_v60 }
  0x2c   :  { %184 = vmatmul.f32.vlgmr.msra.gmra.mxu3 %v43_v61  ;;  %123 = vmatpush.msra.mxu0 %v44_v0 }
  0x2d   :  { %143 = vmatpush.msra.mxu1 %v76_v1  ;;  %124 = vmatmul.f32.vlgmr.msra.gmra.mxu0 %v42_v60 }
  0x2e   :  { %144 = vmatmul.f32.vlgmr.msra.gmra.mxu1 %v43_v61 }
  0xaa   :  { %v125_v2 = vpop.f32.mrf.mxu0 }
  0xab   :  { %v145_v3 = vpop.f32.mrf.mxu1 }
  0xac   :  { %v146_v4 = vadd.f32 %v145_v3, %v125_v2 }
  0xae   :  { %v165_v5 = vpop.f32.mrf.mxu2  ;;  %188 = vst [vmem:[#allocation7] sm:$0xff] %v146_v4 }
  0xaf   :  { %v185_v6 = vpop.f32.mrf.mxu3 }
  0xb0   :  { %v186_v7 = vadd.f32 %v185_v6, %v165_v5 }
  0xb2   :  { %189 = vst [vmem:[#allocation7 + $0x8] sm:$0xff] %v186_v7 }
  0xb3   :  { %200 = dma.vmem_to_hbm [thread:$0]  %s196_s1, 256, %s198_s23, [#allocation4]  }
  0xb4   :  { %289 = dma.done.wait [#allocation4], 256  }
  0xb5   :  { %290 = vsyncadd [#allocation4], 4294967040 }
  0xb6   :  { %205 = vsyncpa [#allocation3], 1 }
  0xb7   :  { %206 = vsyncpa [#allocation6], 1 }
  0xb8   :  { %207 = vsyncpa [#allocation4], 1 }

</bundles_post_ra>
